<compile_context>
chip_gen: v7x
topology: tpu7x:2x2x1
jax: 0.10.0
libtpu: 0.0.40
codegen_flags: <defaults>
</compile_context>

<pallas_src>
import functools

import jax
import jax.numpy as jnp
from jax.experimental import pallas as pl
from jax.experimental.pallas import tpu as pltpu

KERNEL_SIZE = 5
PAD = KERNEL_SIZE // 2  # 2

_TARGET_BLOCK_BYTES = 2 << 20  # ~2 MiB per operand per grid step


def _pick_block_rows(N, L, itemsize):
    """Rows per block: a multiple of 8 that divides N, ~2 MiB per operand."""
    if N % 8 != 0:
        return N  # single full-array block (block_shape == array shape is legal)
    max_rows = max(8, (_TARGET_BLOCK_BYTES // max(1, L * itemsize)) // 8 * 8)
    if max_rows >= N:
        return N
    r = max_rows
    while r > 8 and N % r != 0:
        r -= 8
    return r


def _extract_edges_kernel(x_ref, m_ref, valid_ref, out_ref, *, W):
    # Blocks: x/m/out (R, L) with one full H*W plane per sublane row;
    # valid (8, L) precomputed zero-padding validity rows (grid-invariant).
    x = x_ref[...].astype(jnp.float32)   # (R, L)
    m = m_ref[...].astype(jnp.float32)   # (R, L)
    v = valid_ref[...]                   # (8, L) float 0/1
    L = x.shape[1]

    def shifted(t, d, idx):
        # t[p + d] with zero fill outside the image (the conv's zero padding).
        s = pltpu.roll(t, shift=(-d) % L, axis=1)
        return s * v[idx:idx + 1, :]     # (1, L) broadcast over sublane rows

    # Row pass: 5-wide sum along W (lane shifts of +-1, +-2).
    row = (shifted(x, -2, 0) + shifted(x, -1, 1)) + \
          (shifted(x, 1, 2) + shifted(x, 2, 3)) + x
    # Column pass: 5-tall sum along H (lane shifts of +-W, +-2W).
    box = (shifted(row, -2 * W, 4) + shifted(row, -W, 5)) + \
          (shifted(row, W, 6) + shifted(row, 2 * W, 7)) + row

    # Ones kernel with a -24 center tap  ==  boxsum - 25 * center.
    conv = box - float(KERNEL_SIZE * KERNEL_SIZE) * x
    out_ref[...] = (conv * m).astype(out_ref.dtype)


def extract_edges(x, f2_mask):
    """x: (B, C, H, W), f2_mask: (B, C, H, W) -> (B, C, H, W)."""
    B, C, H, W = x.shape
    L = H * W
    N = B * C
    # Contiguous reshapes (free, no HBM round-trip): fuse B*C on the sublane
    # axis, flatten each H*W plane onto the lane axis (lane-dense stores).
    xf = x.reshape(N, L)
    mf = f2_mask.reshape(N, L)

    # Grid-invariant zero-padding validity rows, one per stencil shift,
    # precomputed once (hoists iota / % / // / compares out of the kernel).
    lane = jnp.arange(L, dtype=jnp.int32)
    wi = lane % W
    hi = lane // W
    valid_tbl = jnp.stack([
        (wi >= 2), (wi >= 1), (wi <= W - 2), (wi <= W - 3),   # d = -2,-1,+1,+2
        (hi >= 2), (hi >= 1), (hi <= H - 2), (hi <= H - 3),   # d = -2W,-W,+W,+2W
    ]).astype(jnp.float32)                                    # (8, L)

    R = _pick_block_rows(N, L, jnp.dtype(x.dtype).itemsize)
    grid = (pl.cdiv(N, R),)

    kernel = functools.partial(_extract_edges_kernel, W=W)
    out = pl.pallas_call(
        kernel,
        out_shape=jax.ShapeDtypeStruct((N, L), x.dtype),
        grid_spec=pltpu.PrefetchScalarGridSpec(
            num_scalar_prefetch=0,
            grid=grid,
            in_specs=[
                pl.BlockSpec((R, L), lambda i: (i, 0)),
                pl.BlockSpec((R, L), lambda i: (i, 0)),
                pl.BlockSpec((8, L), lambda i: (0, 0)),  # resident across steps
            ],
            out_specs=pl.BlockSpec((R, L), lambda i: (i, 0)),
        ),
        compiler_params=pltpu.CompilerParams(
            dimension_semantics=("parallel",)),
    )(xf, mf, valid_tbl)
    return out.reshape(B, C, H, W)


def _reference(x, f2_mask):
    # Pure-JAX reference of the PyTorch module for verification.
    k = jnp.ones((KERNEL_SIZE, KERNEL_SIZE), dtype=jnp.float32)
    k = k.at[PAD, PAD].set(-(KERNEL_SIZE ** 2) + 1)
    B, C, H, W = x.shape
    xr = x.reshape(B * C, 1, H, W)
    out = jax.lax.conv_general_dilated(
        xr, k[None, None, :, :], window_strides=(1, 1),
        padding=((PAD, PAD), (PAD, PAD)),
        dimension_numbers=("NCHW", "OIHW", "NCHW"))
    return out.reshape(B, C, H, W) * f2_mask


if __name__ == "__main__":
    key = jax.random.PRNGKey(0)
    kx, km = jax.random.split(key)
    B, C, H, W = 2, 4, 16, 16
    x = jax.random.normal(kx, (B, C, H, W), dtype=jnp.float32)
    f2_mask = (jax.random.uniform(km, (B, C, H, W)) > 0.5).astype(jnp.float32)

    out = jax.block_until_ready(extract_edges(x, f2_mask))
    ref = _reference(x, f2_mask)
    assert out.shape == (B, C, H, W)
    assert jnp.allclose(out, ref, atol=1e-4, rtol=1e-4), "mismatch vs reference"
    print("KERNEL_OK")
</pallas_src>

<mosaic_0001>
module attributes {stable_mosaic.version = 11 : i64} {
  func.func @_extract_edges_kernel(%arg0: i32, %arg1: memref<8x256xf32, #tpu.memory_space<vmem>>, %arg2: memref<8x256xf32, #tpu.memory_space<vmem>>, %arg3: memref<8x256xf32, #tpu.memory_space<vmem>>, %arg4: memref<8x256xf32, #tpu.memory_space<vmem>>) attributes {dimension_semantics = [#tpu.dimension_semantics<parallel>], iteration_bounds = array<i64: 1>, scalar_prefetch = 0 : i64, scratch_operands = 0 : i64, tpu.core_type = #tpu.core_type<tc>, window_params = [{transform_indices = @transform_0, window_bounds = array<i64: 8, 256>}, {transform_indices = @transform_1, window_bounds = array<i64: 8, 256>}, {pipeline_mode = #tpu.pipeline_mode<synchronous>, transform_indices = @transform_2, window_bounds = array<i64: 8, 256>}, {transform_indices = @transform_3, window_bounds = array<i64: 8, 256>}]} {
    %c0 = arith.constant 0 : index
    %c0_0 = arith.constant 0 : index
    %0 = vector.load %arg1[%c0, %c0_0] : memref<8x256xf32, #tpu.memory_space<vmem>>, vector<8x256xf32>
    %c0_1 = arith.constant 0 : index
    %c0_2 = arith.constant 0 : index
    %1 = vector.load %arg2[%c0_1, %c0_2] : memref<8x256xf32, #tpu.memory_space<vmem>>, vector<8x256xf32>
    %c0_3 = arith.constant 0 : index
    %c0_4 = arith.constant 0 : index
    %2 = vector.load %arg3[%c0_3, %c0_4] : memref<8x256xf32, #tpu.memory_space<vmem>>, vector<8x256xf32>
    %c2_i32 = arith.constant 2 : i32
    %3 = tpu.dynamic_rotate %0 by %c2_i32 dim 1 : vector<8x256xf32>, i32 -> vector<8x256xf32>
    %4 = vector.extract_strided_slice %2 {offsets = [0, 0], sizes = [1, 256], strides = [1, 1]} : vector<8x256xf32> to vector<1x256xf32>
    %5 = vector.broadcast %4 : vector<1x256xf32> to vector<8x256xf32>
    %6 = arith.mulf %3, %5 : vector<8x256xf32>
    %c1_i32 = arith.constant 1 : i32
    %7 = tpu.dynamic_rotate %0 by %c1_i32 dim 1 : vector<8x256xf32>, i32 -> vector<8x256xf32>
    %8 = vector.extract_strided_slice %2 {offsets = [1, 0], sizes = [1, 256], strides = [1, 1]} : vector<8x256xf32> to vector<1x256xf32>
    %9 = vector.broadcast %8 : vector<1x256xf32> to vector<8x256xf32>
    %10 = arith.mulf %7, %9 : vector<8x256xf32>
    %11 = arith.addf %6, %10 : vector<8x256xf32>
    %c255_i32 = arith.constant 255 : i32
    %12 = tpu.dynamic_rotate %0 by %c255_i32 dim 1 : vector<8x256xf32>, i32 -> vector<8x256xf32>
    %13 = vector.extract_strided_slice %2 {offsets = [2, 0], sizes = [1, 256], strides = [1, 1]} : vector<8x256xf32> to vector<1x256xf32>
    %14 = vector.broadcast %13 : vector<1x256xf32> to vector<8x256xf32>
    %15 = arith.mulf %12, %14 : vector<8x256xf32>
    %c254_i32 = arith.constant 254 : i32
    %16 = tpu.dynamic_rotate %0 by %c254_i32 dim 1 : vector<8x256xf32>, i32 -> vector<8x256xf32>
    %17 = vector.extract_strided_slice %2 {offsets = [3, 0], sizes = [1, 256], strides = [1, 1]} : vector<8x256xf32> to vector<1x256xf32>
    %18 = vector.broadcast %17 : vector<1x256xf32> to vector<8x256xf32>
    %19 = arith.mulf %16, %18 : vector<8x256xf32>
    %20 = arith.addf %15, %19 : vector<8x256xf32>
    %21 = arith.addf %11, %20 : vector<8x256xf32>
    %22 = arith.addf %21, %0 : vector<8x256xf32>
    %c32_i32 = arith.constant 32 : i32
    %23 = tpu.dynamic_rotate %22 by %c32_i32 dim 1 : vector<8x256xf32>, i32 -> vector<8x256xf32>
    %24 = vector.extract_strided_slice %2 {offsets = [4, 0], sizes = [1, 256], strides = [1, 1]} : vector<8x256xf32> to vector<1x256xf32>
    %25 = vector.broadcast %24 : vector<1x256xf32> to vector<8x256xf32>
    %26 = arith.mulf %23, %25 : vector<8x256xf32>
    %c16_i32 = arith.constant 16 : i32
    %27 = tpu.dynamic_rotate %22 by %c16_i32 dim 1 : vector<8x256xf32>, i32 -> vector<8x256xf32>
    %28 = vector.extract_strided_slice %2 {offsets = [5, 0], sizes = [1, 256], strides = [1, 1]} : vector<8x256xf32> to vector<1x256xf32>
    %29 = vector.broadcast %28 : vector<1x256xf32> to vector<8x256xf32>
    %30 = arith.mulf %27, %29 : vector<8x256xf32>
    %31 = arith.addf %26, %30 : vector<8x256xf32>
    %c240_i32 = arith.constant 240 : i32
    %32 = tpu.dynamic_rotate %22 by %c240_i32 dim 1 : vector<8x256xf32>, i32 -> vector<8x256xf32>
    %33 = vector.extract_strided_slice %2 {offsets = [6, 0], sizes = [1, 256], strides = [1, 1]} : vector<8x256xf32> to vector<1x256xf32>
    %34 = vector.broadcast %33 : vector<1x256xf32> to vector<8x256xf32>
    %35 = arith.mulf %32, %34 : vector<8x256xf32>
    %c224_i32 = arith.constant 224 : i32
    %36 = tpu.dynamic_rotate %22 by %c224_i32 dim 1 : vector<8x256xf32>, i32 -> vector<8x256xf32>
    %37 = vector.extract_strided_slice %2 {offsets = [7, 0], sizes = [1, 256], strides = [1, 1]} : vector<8x256xf32> to vector<1x256xf32>
    %38 = vector.broadcast %37 : vector<1x256xf32> to vector<8x256xf32>
    %39 = arith.mulf %36, %38 : vector<8x256xf32>
    %40 = arith.addf %35, %39 : vector<8x256xf32>
    %41 = arith.addf %31, %40 : vector<8x256xf32>
    %42 = arith.addf %41, %22 : vector<8x256xf32>
    %cst = arith.constant 2.500000e+01 : f32
    %43 = vector.broadcast %cst : f32 to vector<8x256xf32>
    %44 = arith.mulf %43, %0 : vector<8x256xf32>
    %45 = arith.subf %42, %44 : vector<8x256xf32>
    %46 = arith.mulf %45, %1 : vector<8x256xf32>
    %c0_5 = arith.constant 0 : index
    %c0_6 = arith.constant 0 : index
    %47 = vector.load %arg4[%c0_5, %c0_6] : memref<8x256xf32, #tpu.memory_space<vmem>>, vector<8x256xf32>
    tpu.vector_store %arg4[%c0_5, %c0_6], %46 {strides = array<i32>} : memref<8x256xf32, #tpu.memory_space<vmem>>, vector<8x256xf32>,
    return
  }
  func.func @transform_0(%arg0: i32) -> (i32, i32) {
    %c0_i32 = arith.constant 0 : i32
    %c0_i32_0 = arith.constant 0 : i32
    return %arg0, %c0_i32 : i32, i32
  }
  func.func @transform_1(%arg0: i32) -> (i32, i32) {
    %c0_i32 = arith.constant 0 : i32
    %c0_i32_0 = arith.constant 0 : i32
    return %arg0, %c0_i32 : i32, i32
  }
  func.func @transform_2(%arg0: i32) -> (i32, i32) {
    %c0_i32 = arith.constant 0 : i32
    %c0_i32_0 = arith.constant 0 : i32
    %c0_i32_1 = arith.constant 0 : i32
    return %c0_i32, %c0_i32_0 : i32, i32
  }
  func.func @transform_3(%arg0: i32) -> (i32, i32) {
    %c0_i32 = arith.constant 0 : i32
    %c0_i32_0 = arith.constant 0 : i32
    return %arg0, %c0_i32 : i32, i32
  }
}

</mosaic_0001>

<bundles_post_ra>
// kernel: tpu_custom_call.1
= control target key start
LH: loop header
LB: loop body
LE: loop exit
PB: predicated region body
PF: predicated region fallthrough
CT: control target
= control target key end

     0   :  { %8 = vsyncpa [#allocation3], 0  ;;  %s484_s0 = inlined_call_operand.hbm [shape: f32[8,256], index: 0, kind: input, shape index: {}]   ;;  %s485_s1 = inlined_call_operand.hbm [shape: f32[8,256], index: 1, kind: input, shape index: {}]   ;;  %s486_s2 = inlined_call_operand.hbm [shape: f32[8,256], index: 2, kind: input, shape index: {}]   ;;  %s487_s3 = inlined_call_operand.hbm [shape: f32[8,256], index: 3, kind: output, shape index: {}]  }
   0x1   :  { %9 = vsyncpa [#allocation6], 0 }
   0x2   :  { %10 = vsyncpa [#allocation4], 0  ;;  %s340_s12 = smov [#allocation5]   ;;  %s341_s14 = smov [#allocation2]  }
   0x3   :  { %s27_s13 = sshll.u32 %s340_s12, 4  ;;  %s17_s15 = sshll.u32 %s341_s14, 4  ;;  %s28_s13 = int_to_ptr.vmem [resolvable:$true] %s27_s13  ;;  %s18_s15 = int_to_ptr.vmem [resolvable:$true] %s17_s15 }
   0x4   :  { %s246_s18 = scalar_lea.hbm %s485_s1, 256 }
   0x5   :  { %p247_p0 = scmp.ne.s32.totalorder %s485_s1, %s246_s18  ;;  %p250_p1 = scmp.lt.u32.totalorder %s246_s18, %s485_s1 }
   0x7   :  { %p252_p2 = pnand %p250_p1, %p247_p0 }
   0x9   :  { %255 = shalt.err (!%p252_p2)
}
   0xa   :  { %s256_s23 = scalar_lea.vmem %s28_s13, 256  ;;  %p261_p4 = scmp.lt.s32.totalorder %s28_s13, %s28_s13 }
   0xb   :  { %p257_p3 = scmp.ne.s32.totalorder %s28_s13, %s256_s23  ;;  %p262_p5 = scmp.lt.s32.totalorder %s256_s23, %s256_s23 }
   0xd   :  { %p263_p6 = por %p262_p5, %p261_p4 }
   0xf   :  { %p264_p7 = pnand %p263_p6, %p257_p3 }
  0x11   :  { %267 = shalt.err (!%p264_p7)
}
  0x12   :  { %30 = dma.hbm_to_vmem [thread:$0]  %s485_s1, 256, %s28_s13, [#allocation6]  }
  0x13   :  { %s268_s28 = scalar_lea.hbm %s484_s0, 256 }
  0x14   :  { %p269_p8 = scmp.ne.s32.totalorder %s484_s0, %s268_s28  ;;  %p272_p9 = scmp.lt.u32.totalorder %s268_s28, %s484_s0 }
  0x16   :  { %p274_p10 = pnand %p272_p9, %p269_p8 }
  0x18   :  { %277 = shalt.err (!%p274_p10)
}
  0x19   :  { %s278_s6 = scalar_lea.vmem %s18_s15, 256  ;;  %p283_p12 = scmp.lt.s32.totalorder %s18_s15, %s18_s15 }
  0x1a   :  { %p279_p11 = scmp.ne.s32.totalorder %s18_s15, %s278_s6  ;;  %p284_p13 = scmp.lt.s32.totalorder %s278_s6, %s278_s6 }
  0x1c   :  { %p285_p0 = por %p284_p13, %p283_p12 }
  0x1e   :  { %p286_p1 = pnand %p285_p0, %p279_p11 }
  0x20   :  { %289 = shalt.err (!%p286_p1)
}
  0x21   :  { %20 = dma.hbm_to_vmem [thread:$0]  %s484_s0, 256, %s18_s15, [#allocation3]  }
  0x22   :  { %s342_s8 = smov [#allocation7]   ;;  %s290_s12 = scalar_lea.hbm %s486_s2, 256 }
  0x23   :  { %s37_s9 = sshll.u32 %s342_s8, 4  ;;  %p291_p2 = scmp.ne.s32.totalorder %s486_s2, %s290_s12  ;;  %s38_s9 = int_to_ptr.vmem [resolvable:$true] %s37_s9 }
  0x24   :  { %p294_p3 = scmp.lt.u32.totalorder %s290_s12, %s486_s2 }
  0x26   :  { %p296_p4 = pnand %p294_p3, %p291_p2 }
  0x28   :  { %299 = shalt.err (!%p296_p4)
}
  0x29   :  { %s300_s18 = scalar_lea.vmem %s38_s9, 256  ;;  %p305_p6 = scmp.lt.s32.totalorder %s38_s9, %s38_s9 }
  0x2a   :  { %p301_p5 = scmp.ne.s32.totalorder %s38_s9, %s300_s18  ;;  %p306_p7 = scmp.lt.s32.totalorder %s300_s18, %s300_s18 }
  0x2c   :  { %p307_p8 = por %p306_p7, %p305_p6 }
  0x2e   :  { %p308_p9 = pnand %p307_p8, %p301_p5 }
  0x30   :  { %311 = shalt.err (!%p308_p9)
}
  0x31   :  { %40 = dma.hbm_to_vmem [thread:$0]  %s486_s2, 256, %s38_s9, [#allocation6]  }
  0x32   :  { %334 = dma.done.wait [#allocation3], 256  }
  0x33   :  { %335 = vsyncadd [#allocation3], 4294967040 }
  0x34   :  { %336 = dma.done.wait [#allocation6], 512  }
  0x35   :  { %337 = vsyncadd [#allocation6], 4294966784  ;;  %v408_v0 = vld [vmem:[#allocation2] sm:$0xff]  ;;  %s343_s19 = smov 1   ;;  %s344_s20 = smov 2   ;;  %v412_v1 = vld [vmem:[#allocation2 + $0x8] sm:$0xff]  ;;  %v60_v2 = vlaneseq }
  0x36   :  { %75 = vrot.lane.b32.xlu1 %v408_v0, %s343_s19  ;;  %56 = vrot.lane.b32.xlu0 %v408_v0, %s344_s20  ;;  %s345_s21 = smov 127   ;;  %s346_s2 = smov 126   ;;  %v426_v11 = vld [vmem:[#allocation7] sm:$0xff]  ;;  %v428_v12 = vld [vmem:[#allocation7 + $0x8] sm:$0xff] }
  0x37   :  { %v420_v5 = vshrl.u32 %v60_v2, 7  ;;  %v422_v6 = vand.u32 127, %v60_v2  ;;  %s347_s22 = smov 32   ;;  %s348_s23 = smov 16  }
  0x38   :  { %s349_s24 = smov 112   ;;  %s350_s25 = smov 96  }
  0x39   :  { %v84_v7 = vsub.s32 1, %v420_v5  ;;  %v67_v9 = vsub.s32 0, %v420_v5  ;;  %vm79_vm0 = vcmp.lt.s32.totalorder %v422_v6, 1  ;;  %vm62_vm1 = vcmp.lt.s32.totalorder %v422_v6, 2  ;;  %s351_s26 = smov [#allocation8]  }
  0x3a   :  { %77 = vrot.lane.b32.xlu1 %v412_v1, %s343_s19  ;;  %58 = vrot.lane.b32.xlu0 %v412_v1, %s344_s20  ;;  %v103_v13 = vsub.s32 2, %v420_v5  ;;  %v120_v14 = vsub.s32 3, %v420_v5  ;;  %vm98_vm2 = vcmp.lt.s32.totalorder %v422_v6, 127  ;;  %vm115_vm3 = vcmp.lt.s32.totalorder %v422_v6, 126  ;;  %s224_s27 = sshll.u32 %s351_s26, 4  ;;  %s225_s27 = int_to_ptr.vmem [resolvable:$true] %s224_s27 }
  0x3b   :  { %v85_v15 = vrot.slane %v426_v11, %v84_v7  ;;  %v89_v16 = vrot.slane %v428_v12, %v84_v7  ;;  %v68_v17 = vrot.slane %v426_v11, %v67_v9  ;;  %v72_v18 = vrot.slane %v428_v12, %v67_v9  ;;  %s312_s28 = scalar_lea.vmem %s225_s27, 256  ;;  %p317_p11 = scmp.lt.s32.totalorder %s225_s27, %s225_s27 }
  0x3c   :  { %v104_v25 = vrot.slane %v426_v11, %v103_v13  ;;  %v108_v26 = vrot.slane %v428_v12, %v103_v13  ;;  %v121_v27 = vrot.slane %v426_v11, %v120_v14  ;;  %v125_v28 = vrot.slane %v428_v12, %v120_v14  ;;  %p313_p10 = scmp.ne.s32.totalorder %s225_s27, %s312_s28  ;;  %p318_p12 = scmp.lt.s32.totalorder %s312_s28, %s312_s28 }
  0x3d   :  { %v143_v53 = vsub.s32 4, %v420_v5  ;;  %v160_v55 = vsub.s32 5, %v420_v5  ;;  %v179_v57 = vsub.s32 6, %v420_v5  ;;  %vm155_vm4 = vcmp.lt.s32.totalorder %v422_v6, 16 }
  0x3e   :  { %96 = vrot.lane.b32.xlu1 %v412_v1, %s345_s21  ;;  %94 = vrot.lane.b32.xlu0 %v408_v0, %s345_s21  ;;  %v196_v58 = vsub.s32 7, %v420_v5  ;;  %vm138_vm5 = vcmp.lt.s32.totalorder %v422_v6, 32  ;;  %vm174_vm6 = vcmp.lt.s32.totalorder %v422_v6, 112  ;;  %vm191_vm7 = vcmp.lt.s32.totalorder %v422_v6, 96  ;;  %p319_p13 = por %p318_p12, %p317_p11 }
  0x3f   :  { %v144_v59 = vrot.slane %v426_v11, %v143_v53  ;;  %v148_v60 = vrot.slane %v428_v12, %v143_v53  ;;  %v161_v61 = vrot.slane %v426_v11, %v160_v55  ;;  %v165_v62 = vrot.slane %v428_v12, %v160_v55 }
  0x40   :  { %v180_v2 = vrot.slane %v426_v11, %v179_v57  ;;  %v184_v5 = vrot.slane %v428_v12, %v179_v57  ;;  %v201_v13 = vrot.slane %v428_v12, %v196_v58  ;;  %p320_p0 = pnand %p319_p13, %p313_p10 }
  0x42   :  { %113 = vrot.lane.b32.xlu1 %v412_v1, %s346_s2  ;;  %111 = vrot.lane.b32.xlu0 %v408_v0, %s346_s2 }
  0xa8   :  { %v76_v3 = vpop.permute.xlu1 %75  ;;  %v57_v4 = vpop.permute.xlu0 %56 }
  0xac   :  { %v78_v8 = vpop.permute.xlu1 %77  ;;  %v59_v10 = vpop.permute.xlu0 %58 }
  0xad   :  { %v80_v21 = vsel %vm79_vm0, %v76_v3, %v78_v8  ;;  %v81_v22 = vsel %vm79_vm0, %v78_v8, %v76_v3  ;;  %v63_v23 = vsel %vm62_vm1, %v57_v4, %v59_v10  ;;  %v64_v24 = vsel %vm62_vm1, %v59_v10, %v57_v4 }
  0xae   :  { %v90_v31 = vmul.f32 %v85_v15, %v81_v22  ;;  %v91_v32 = vmul.f32 %v89_v16, %v80_v21  ;;  %v73_v33 = vmul.f32 %v68_v17, %v64_v24  ;;  %v74_v34 = vmul.f32 %v72_v18, %v63_v23 }
  0xaf   :  { %v197_v10 = vrot.slane %v426_v11, %v196_v58 }
  0xb0   :  { %v97_v19 = vpop.permute.xlu1 %96  ;;  %v95_v20 = vpop.permute.xlu0 %94  ;;  %v92_v43 = vadd.f32 %v90_v31, %v73_v33  ;;  %v93_v44 = vadd.f32 %v91_v32, %v74_v34  ;;  %v210_v31 = vmul.f32 25.0, %v408_v0  ;;  %v211_v32 = vmul.f32 25.0, %v412_v1 }
  0xb1   :  { %v99_v29 = vsel %vm98_vm2, %v95_v20, %v97_v19  ;;  %v100_v30 = vsel %vm98_vm2, %v97_v19, %v95_v20 }
  0xb2   :  { %v109_v39 = vmul.f32 %v104_v25, %v99_v29  ;;  %v110_v40 = vmul.f32 %v108_v26, %v100_v30 }
  0xb4   :  { %v114_v35 = vpop.permute.xlu1 %113  ;;  %v112_v36 = vpop.permute.xlu0 %111 }
  0xb5   :  { %v116_v37 = vsel %vm115_vm3, %v112_v36, %v114_v35  ;;  %v117_v38 = vsel %vm115_vm3, %v114_v35, %v112_v36  ;;  %v52_v35 = vld [vmem:[#allocation5] sm:$0xff]  ;;  %v53_v36 = vld [vmem:[#allocation5 + $0x8] sm:$0xff] }
  0xb6   :  { %v126_v41 = vmul.f32 %v121_v27, %v116_v37  ;;  %v127_v42 = vmul.f32 %v125_v28, %v117_v38 }
  0xb8   :  { %v128_v45 = vadd.f32 %v126_v41, %v109_v39  ;;  %v129_v46 = vadd.f32 %v127_v42, %v110_v40 }
  0xba   :  { %v130_v47 = vadd.f32 %v128_v45, %v92_v43  ;;  %v131_v48 = vadd.f32 %v129_v46, %v93_v44 }
  0xbc   :  { %v132_v49 = vadd.f32 %v130_v47, %v408_v0  ;;  %v133_v50 = vadd.f32 %v131_v48, %v412_v1 }
  0xbe   :  { %136 = vrot.lane.b32.xlu1 %v133_v50, %s347_s22  ;;  %134 = vrot.lane.b32.xlu0 %v132_v49, %s347_s22 }
  0xc2   :  { %153 = vrot.lane.b32.xlu1 %v133_v50, %s348_s23  ;;  %151 = vrot.lane.b32.xlu0 %v132_v49, %s348_s23 }
  0xc6   :  { %172 = vrot.lane.b32.xlu1 %v133_v50, %s349_s24  ;;  %170 = vrot.lane.b32.xlu0 %v132_v49, %s349_s24 }
  0xca   :  { %189 = vrot.lane.b32.xlu1 %v133_v50, %s350_s25  ;;  %187 = vrot.lane.b32.xlu0 %v132_v49, %s350_s25 }
 0x130   :  { %v137_v51 = vpop.permute.xlu1 %136  ;;  %v135_v52 = vpop.permute.xlu0 %134 }
 0x131   :  { %v139_v8 = vsel %vm138_vm5, %v135_v52, %v137_v51  ;;  %v140_v9 = vsel %vm138_vm5, %v137_v51, %v135_v52 }
 0x132   :  { %v149_v20 = vmul.f32 %v144_v59, %v140_v9  ;;  %v150_v21 = vmul.f32 %v148_v60, %v139_v8 }
 0x134   :  { %v154_v54 = vpop.permute.xlu1 %153  ;;  %v152_v56 = vpop.permute.xlu0 %151 }
 0x135   :  { %v156_v4 = vsel %vm155_vm4, %v152_v56, %v154_v54  ;;  %v157_v7 = vsel %vm155_vm4, %v154_v54, %v152_v56 }
 0x136   :  { %v166_v16 = vmul.f32 %v161_v61, %v157_v7  ;;  %v167_v17 = vmul.f32 %v165_v62, %v156_v4 }
 0x138   :  { %v173_v63 = vpop.permute.xlu1 %172  ;;  %v171_v3 = vpop.permute.xlu0 %170  ;;  %v168_v27 = vadd.f32 %v166_v16, %v149_v20  ;;  %v169_v28 = vadd.f32 %v167_v17, %v150_v21 }
 0x139   :  { %v175_v14 = vsel %vm174_vm6, %v171_v3, %v173_v63  ;;  %v176_v15 = vsel %vm174_vm6, %v173_v63, %v171_v3 }
 0x13a   :  { %v185_v24 = vmul.f32 %v180_v2, %v175_v14  ;;  %v186_v25 = vmul.f32 %v184_v5, %v176_v15 }
 0x13c   :  { %v190_v18 = vpop.permute.xlu1 %189  ;;  %v188_v19 = vpop.permute.xlu0 %187 }
 0x13d   :  { %v192_v22 = vsel %vm191_vm7, %v188_v19, %v190_v18  ;;  %v193_v23 = vsel %vm191_vm7, %v190_v18, %v188_v19 }
 0x13e   :  { %v202_v26 = vmul.f32 %v197_v10, %v192_v22  ;;  %v203_v6 = vmul.f32 %v201_v13, %v193_v23 }
 0x140   :  { %v204_v29 = vadd.f32 %v202_v26, %v185_v24  ;;  %v205_v11 = vadd.f32 %v203_v6, %v186_v25 }
 0x142   :  { %v206_v30 = vadd.f32 %v204_v29, %v168_v27  ;;  %v207_v12 = vadd.f32 %v205_v11, %v169_v28 }
 0x144   :  { %v208_v33 = vadd.f32 %v206_v30, %v132_v49  ;;  %v209_v34 = vadd.f32 %v207_v12, %v133_v50 }
 0x146   :  { %v212_v37 = vsub.f32 %v208_v33, %v210_v31  ;;  %v213_v38 = vsub.f32 %v209_v34, %v211_v32 }
 0x148   :  { %v214_v39 = vmul.f32 %v212_v37, %v52_v35  ;;  %v215_v40 = vmul.f32 %v213_v38, %v53_v36 }
 0x14a   :  { %216 = vst [vmem:[#allocation8] sm:$0xff] %v214_v39  ;;  %217 = vst [vmem:[#allocation8 + $0x8] sm:$0xff] %v215_v40 }
 0x14b   :  { %323 = shalt.err (!%p320_p0)
}
 0x14c   :  { %s324_s4 = scalar_lea.hbm %s487_s3, 256 }
 0x14d   :  { %p325_p1 = scmp.ne.s32.totalorder %s487_s3, %s324_s4  ;;  %p328_p2 = scmp.lt.u32.totalorder %s324_s4, %s487_s3 }
 0x14f   :  { %p330_p3 = pnand %p328_p2, %p325_p1 }
 0x151   :  { %333 = shalt.err (!%p330_p3)
}
 0x152   :  { %227 = dma.vmem_to_hbm [thread:$0]  %s225_s27, 256, %s487_s3, [#allocation4]  }
 0x153   :  { %338 = dma.done.wait [#allocation4], 256  }
 0x154   :  { %339 = vsyncadd [#allocation4], 4294967040 }
 0x155   :  { %231 = vsyncpa [#allocation3], 1 }
 0x156   :  { %232 = vsyncpa [#allocation6], 1 }
 0x157   :  { %233 = vsyncpa [#allocation4], 1 }

</bundles_post_ra>
